<compile_context>
chip_gen: v5e
topology: v5e:2x2
jax: 0.10.0
libtpu: 0.0.40
codegen_flags: <defaults>
</compile_context>

<pallas_src>
import jax
import jax.numpy as jnp
from jax import lax
from jax.experimental import pallas as pl
from jax.experimental.pallas import tpu as pltpu


def _mlp_kernel(x_ref, w1_ref, b1_ref, w2_ref, b2_ref, o_ref):
    x = x_ref[...]                               # (TB, 10) f32
    # fc1: x @ w1.T with w1 in PyTorch (out, in) layout -> contract dim 1 of
    # both operands on the MXU, f32 accumulate.
    h = lax.dot_general(
        x, w1_ref[...],
        dimension_numbers=(((1,), (1,)), ((), ())),
        preferred_element_type=jnp.float32,
    )
    h = jnp.maximum(h + b1_ref[...], 0.0)        # (TB, 10), bias broadcast
    # fc2 on the VPU: w2 is a (1, 10) row -> elementwise mul + lane reduce.
    y = jnp.sum(h * w2_ref[...], axis=-1, keepdims=True)   # (TB, 1)
    # b2 is a scalar sitting in SMEM.
    o_ref[...] = y + b2_ref[0, 0]


def simple_nn_forward(x, w1, b1, w2, b2, *, tb=512):
    """Forward pass of SimpleNN.

    x:  (B, 10)  float32
    w1: (10, 10) PyTorch layout (out, in)
    b1: (10,)
    w2: (1, 10)  PyTorch layout (out, in)
    b2: (1,)
    returns (B, 1) float32
    """
    B = x.shape[0]
    b1_r = b1.reshape(1, -1)          # (1, 10) for sublane broadcast
    b2_r = b2.reshape(1, 1)           # (1, 1)  SMEM scalar

    vmem_full = pl.BlockSpec(memory_space=pltpu.MemorySpace.VMEM)
    smem_full = pl.BlockSpec(memory_space=pltpu.MemorySpace.SMEM)

    call_kwargs = {}
    if B <= tb:
        # Tiny batch: single block, no grid, no pipelining overhead.
        grid = ()
        x_spec = pl.BlockSpec(memory_space=pltpu.MemorySpace.VMEM)
        o_spec = pl.BlockSpec(memory_space=pltpu.MemorySpace.VMEM)
    else:
        # Batch-tiled grid: double-buffered activation stream, weights stay
        # resident.  Parallel batch axis -> sharded across TCs on v7x.
        grid = (pl.cdiv(B, tb),)
        x_spec = pl.BlockSpec((tb, 10), lambda i: (i, 0))
        o_spec = pl.BlockSpec((tb, 1), lambda i: (i, 0))
        call_kwargs["compiler_params"] = pltpu.CompilerParams(
            dimension_semantics=("parallel",))

    return pl.pallas_call(
        _mlp_kernel,
        out_shape=jax.ShapeDtypeStruct((B, 1), jnp.float32),
        grid=grid,
        in_specs=[x_spec, vmem_full, vmem_full, vmem_full, smem_full],
        out_specs=o_spec,
        **call_kwargs,
    )(x, w1, b1_r, w2, b2_r)


def _reference(x, w1, b1, w2, b2):
    h = jnp.maximum(x @ w1.T + b1, 0.0)
    return h @ w2.T + b2


if __name__ == "__main__":
    key = jax.random.PRNGKey(0)
    kx, k1, k2, k3, k4, kbig = jax.random.split(key, 6)

    # Deterministic parameters (shapes match nn.Linear(10,10), nn.Linear(10,1)).
    w1 = jax.random.normal(k1, (10, 10), dtype=jnp.float32) * 0.1
    b1 = jax.random.normal(k2, (10,), dtype=jnp.float32) * 0.1
    w2 = jax.random.normal(k3, (1, 10), dtype=jnp.float32) * 0.1
    b2 = jax.random.normal(k4, (1,), dtype=jnp.float32) * 0.1

    # Small batch: grid=() fast path.
    B = 8
    x = jax.random.normal(kx, (B, 10), dtype=jnp.float32)
    out = jax.block_until_ready(simple_nn_forward(x, w1, b1, w2, b2))
    ref = _reference(x, w1, b1, w2, b2)
    assert out.shape == (B, 1)
    assert jnp.allclose(out, ref, atol=1e-5, rtol=1e-5), "mismatch (small B)"

    # Larger batch: exercises the batch-tiled, parallel-grid path.
    Bb = 1024
    xb = jax.random.normal(kbig, (Bb, 10), dtype=jnp.float32)
    outb = jax.block_until_ready(simple_nn_forward(xb, w1, b1, w2, b2, tb=256))
    refb = _reference(xb, w1, b1, w2, b2)
    assert outb.shape == (Bb, 1)
    assert jnp.allclose(outb, refb, atol=1e-5, rtol=1e-5), "mismatch (large B)"

    print("KERNEL_OK")
</pallas_src>

<mosaic_0001>
module attributes {stable_mosaic.version = 11 : i64} {
  func.func @_mlp_kernel(%arg0: memref<8x10xf32, #tpu.memory_space<vmem>>, %arg1: memref<10x10xf32, #tpu.memory_space<vmem>>, %arg2: memref<1x10xf32, #tpu.memory_space<vmem>>, %arg3: memref<1x10xf32, #tpu.memory_space<vmem>>, %arg4: memref<1x1xf32, #tpu.memory_space<smem>>, %arg5: memref<8x1xf32, #tpu.memory_space<vmem>>) attributes {dimension_semantics = [], scalar_prefetch = 0 : i64, scratch_operands = 0 : i64, tpu.core_type = #tpu.core_type<tc>} {
    %c0 = arith.constant 0 : index
    %c0_0 = arith.constant 0 : index
    %0 = vector.load %arg0[%c0, %c0_0] : memref<8x10xf32, #tpu.memory_space<vmem>>, vector<8x10xf32>
    %c0_1 = arith.constant 0 : index
    %c0_2 = arith.constant 0 : index
    %1 = vector.load %arg1[%c0_1, %c0_2] : memref<10x10xf32, #tpu.memory_space<vmem>>, vector<10x10xf32>
    %cst = arith.constant dense<0.000000e+00> : vector<8x10xf32>
    %2 = tpu.matmul %0, %1, %cst {dimension_numbers = #tpu.dot_dimension_numbers<[1], [1], [0], [0], [0, 0, 1, 0], [], []>} : vector<8x10xf32>, vector<10x10xf32>, vector<8x10xf32> -> vector<8x10xf32>
    %c0_3 = arith.constant 0 : index
    %c0_4 = arith.constant 0 : index
    %3 = vector.load %arg2[%c0_3, %c0_4] : memref<1x10xf32, #tpu.memory_space<vmem>>, vector<1x10xf32>
    %4 = vector.broadcast %3 : vector<1x10xf32> to vector<8x10xf32>
    %5 = arith.addf %2, %4 : vector<8x10xf32>
    %cst_5 = arith.constant 0.000000e+00 : f32
    %6 = vector.broadcast %cst_5 : f32 to vector<8x10xf32>
    %7 = arith.maximumf %5, %6 : vector<8x10xf32>
    %c0_6 = arith.constant 0 : index
    %c0_7 = arith.constant 0 : index
    %8 = vector.load %arg3[%c0_6, %c0_7] : memref<1x10xf32, #tpu.memory_space<vmem>>, vector<1x10xf32>
    %9 = vector.broadcast %8 : vector<1x10xf32> to vector<8x10xf32>
    %10 = arith.mulf %7, %9 : vector<8x10xf32>
    %cst_8 = arith.constant dense<0.000000e+00> : vector<8xf32>
    %11 = vector.multi_reduction <add>, %10, %cst_8 [1] : vector<8x10xf32> to vector<8xf32>
    %12 = vector.shape_cast %11 : vector<8xf32> to vector<8x1xf32>
    %c0_9 = arith.constant 0 : index
    %c0_10 = arith.constant 0 : index
    %13 = memref.load %arg4[%c0_9, %c0_10] : memref<1x1xf32, #tpu.memory_space<smem>>
    %14 = vector.broadcast %13 : f32 to vector<8x1xf32>
    %15 = arith.addf %12, %14 : vector<8x1xf32>
    %c0_11 = arith.constant 0 : index
    %c0_12 = arith.constant 0 : index
    %16 = vector.load %arg5[%c0_11, %c0_12] : memref<8x1xf32, #tpu.memory_space<vmem>>, vector<8x1xf32>
    tpu.vector_store %arg5[%c0_11, %c0_12], %15 {strides = array<i32>} : memref<8x1xf32, #tpu.memory_space<vmem>>, vector<8x1xf32>,
    return
  }
}

</mosaic_0001>

<bundles_post_ra>
// kernel: tpu_custom_call.1
= control target key start
LH: loop header
LB: loop body
LE: loop exit
PB: predicated region body
PF: predicated region fallthrough
CT: control target
= control target key end

     0   :  { %11 = vsyncpa [#allocation4], 0  ;;  %s221_s0 = inlined_call_operand.hbm [shape: f32[8,10], index: 0, kind: input, shape index: {}]   ;;  %s222_s1 = inlined_call_operand.hbm [shape: f32[10,10], index: 1, kind: input, shape index: {}]   ;;  %s223_s2 = inlined_call_operand.vmem [shape: f32[1,10], index: 2, kind: input, shape index: {}]   ;;  %s224_s3 = inlined_call_operand.vmem [shape: f32[1,10], index: 3, kind: input, shape index: {}]   ;;  %s225_s4 = inlined_call_operand.<no memory space> [shape: f32[1,1], index: 4, kind: input, shape index: {}]   ;;  %s226_s5 = inlined_call_operand.vmem [shape: f32[8,1], index: 5, kind: output, shape index: {}]  }
   0x1   :  { %s18_s20 = sshll.u32 %s221_s0, 4  ;;  %s19_s20 = int_to_ptr.hbm [resolvable:$true] %s18_s20 }
   0x2   :  { %12 = vsyncpa [#allocation6], 0  ;;  %s169_s21 = smov [#allocation3]   ;;  %s28_s25 = sshll.u32 %s222_s1, 4  ;;  %s29_s25 = int_to_ptr.hbm [resolvable:$true] %s28_s25 }
   0x3   :  { %s20_s22 = sshll.u32 %s169_s21, 4  ;;  %s170_s26 = smov [#allocation5]   ;;  %s21_s22 = int_to_ptr.vmem [resolvable:$true] %s20_s22 }
   0x4   :  { %23 = dma.hbm_to_vmem [thread:$0]  %s19_s20, 128, %s21_s22, [#allocation4]  }
   0x5   :  { %s30_s27 = sshll.u32 %s170_s26, 4  ;;  %s171_s28 = smov 128   ;;  %s31_s27 = int_to_ptr.vmem [resolvable:$true] %s30_s27 }
   0x6   :  { %s172_s29 = smov 8  }
   0x7   :  { %36 = dma.hbm_to_vmem [thread:$0]  %s29_s25, 256, %s31_s27, [#allocation6], %s171_s28, %s171_s28, %s172_s29  }
   0x8   :  { %165 = dma.done.wait [#allocation4], 128  }
   0x9   :  { %166 = vsyncadd [#allocation4], 4294967168 }
   0xa   :  { %167 = dma.done.wait [#allocation6], 256  }
   0xb   :  { %168 = vsyncadd [#allocation6], 4294967040  ;;  %vm58_vm0 = vcmask 80896   ;;  %v53_v0 = vld [vmem:[#allocation5 + $0x8] sm:$0x3]  ;;  %v52_v1 = vld [vmem:[#allocation5] sm:$0xff]  ;;  %v98_v10 = vstv %s225_s4 }
   0xc   :  { %108 = vmatpush.xpose.msk.msra.mxu0 %vm58_vm0, %v53_v0  ;;  %v51_v2 = vld [vmem:[#allocation3] sm:$0xff]  ;;  %vm100_vm1 = vcmask 7168  }
   0xd   :  { %v115_v3 = vld [vmem:[%s223_s2] ss:$0 sm:$0xff] }
   0xe   :  { %v116_v6 = vld [vmem:[%s224_s3] ss:$0 sm:$0xff] }
  0x10   :  { %109 = vmatpush.xpose.msk.msra.mxu0 %vm58_vm0, %v52_v1 }
  0x13   :  { %110 = vmatmul.msk.f32.vlgmr.msra.gmra.mxu0 %vm58_vm0, %v51_v2 }
  0x90   :  { %v85_v4 = vpop.f32.mrf.mxu0 }
  0x91   :  { %v86_v5 = vadd.f32 %v115_v3, %v85_v4 }
  0x93   :  { %v88_v7 = vmax.f32 %v86_v5, 0.0 }
  0x95   :  { %v93_v8 = vmul.f32 %v116_v6, %v88_v7 }
  0x97   :  { %v94_v9 = vsel %vm58_vm0, %v93_v8, 0.0 }
  0x98   :  { %95 = vadd.xlane.f32.xlu0 %v94_v9 }
 0x10b   :  { %v96_v11 = vpop.xlane.xlu0 %95 }
 0x10c   :  { %v99_v12 = vadd.f32 %v98_v10, %v96_v11 }
 0x10e   :  { %101 = vst.msk [vmem:[%s226_s5] sm:$0xff] %vm100_vm1, %v99_v12 }
 0x10f   :  { %106 = vsyncpa [#allocation4], 1 }
 0x110   :  { %107 = vsyncpa [#allocation6], 1 }

</bundles_post_ra>
